<compile_context>
chip_gen: v7x
topology: tpu7x:2x2x1
jax: 0.10.0
libtpu: 0.0.40
codegen_flags: <defaults>
</compile_context>

<pallas_src>
import math

import jax
import jax.numpy as jnp
from jax import lax
from jax.experimental import pallas as pl
from jax.experimental.pallas import tpu as pltpu

EMBED = 5                        # per-table embedding size (module hardcodes 5)
NUM_DIST = 3
NUM_BASE = 5
NUM_TYPES = NUM_BASE * NUM_DIST  # 15 combined edge types
KPAD = 16                        # padded combined-type count (contraction dim)


def edge_embed_kernel(idx_ref, fused_t_ref, o_ref):
    """One tile of TM edge-type indices -> transposed output embeddings.

    idx_ref:     (1, TM)       int32  combined edge-type index (== x), lane-dense
    fused_t_ref: (E, KPAD)     f32    column t = Linear(ReLU(cat_embed[t]))
    o_ref:       (E, TM)       f32    transposed output tile (lane-dense stores)
    """
    idx = idx_ref[...]                                         # (1, TM) int32
    k = fused_t_ref.shape[1]                                   # KPAD
    tm = idx.shape[1]

    # Gather-as-matmul, transposed: onehot^T[t, j] = (t == idx[j]).
    iota = lax.broadcasted_iota(jnp.int32, (k, tm), 0)         # (KPAD, TM)
    onehot_t = (iota == idx).astype(jnp.float32)               # (KPAD, TM)

    # Exact row selection of the (pre-folded, f32) fused table.
    o_ref[...] = jnp.dot(fused_t_ref[...], onehot_t,
                         preferred_element_type=jnp.float32).astype(o_ref.dtype)


def edge_type_embedding(x, base_embed, dist_embed, w, b, *, tile_m=4096):
    """x: int array, any shape, values in [0, 15).
    base_embed: (5, 5), dist_embed: (3, 5),
    w: (edge_embedding_size, 10) (PyTorch nn.Linear layout), b: (edge_embedding_size,).
    Returns (*x.shape, edge_embedding_size) float32."""
    orig_shape = x.shape
    e_out = w.shape[0]

    # ---- flatten + pad indices to a lane-dense (n_tiles, tile_m) layout ----
    m = math.prod(orig_shape)
    tile_m = pl.cdiv(tile_m, 128) * 128
    tm = min(tile_m, pl.cdiv(m, 128) * 128)        # don't over-tile tiny inputs
    m_pad = pl.cdiv(m, tm) * tm
    n_tiles = m_pad // tm
    idx = jnp.pad(x.reshape(-1).astype(jnp.int32), (0, m_pad - m))
    idx = idx.reshape(n_tiles, tm)

    # ---- one-time parameter fold (trace-constant):                      ----
    # fused[t] = ReLU(cat(base_embed[t//3], dist_embed[t%3])) @ W^T + b
    # so the kernel's one-hot matmul is an exact row select of this table.
    t = jnp.arange(NUM_TYPES)
    cat_embed = jnp.concatenate(
        [base_embed[t // NUM_DIST], dist_embed[t % NUM_DIST]],
        axis=-1).astype(jnp.float32)                              # (15, 10)
    fused = jnp.maximum(cat_embed, 0.0) @ w.T.astype(jnp.float32) \
        + b.astype(jnp.float32)                                   # (15, e_out)
    fused_t = jnp.zeros((e_out, KPAD), jnp.float32)
    fused_t = fused_t.at[:, :NUM_TYPES].set(fused.T)              # (e_out, 16)

    out_t = pl.pallas_call(
        edge_embed_kernel,
        out_shape=jax.ShapeDtypeStruct((e_out, m_pad), jnp.float32),
        grid_spec=pltpu.PrefetchScalarGridSpec(
            num_scalar_prefetch=0,
            grid=(n_tiles,),
            in_specs=[
                pl.BlockSpec((1, tm), lambda i: (i, 0)),        # indices, lane-dense
                pl.BlockSpec((e_out, KPAD), lambda i: (0, 0)),  # fused table (resident)
            ],
            out_specs=pl.BlockSpec((e_out, tm), lambda i: (0, i)),
        ),
        compiler_params=pltpu.CompilerParams(
            dimension_semantics=("parallel",)),
    )(idx, fused_t)

    # One transpose back to the PyTorch layout (lane-dense stores inside the
    # kernel are worth this extra pass; skip it if the consumer can take (E, M)).
    return out_t[:, :m].T.reshape(*orig_shape, e_out)


def _reference(x, base_embed, dist_embed, w, b):
    dist_i = x % NUM_DIST
    base_i = (x - dist_i) // NUM_DIST
    embed = jnp.concatenate([base_embed[base_i], dist_embed[dist_i]], axis=-1)
    return jnp.maximum(embed, 0.0) @ w.T + b


if __name__ == "__main__":
    key = jax.random.PRNGKey(0)
    k1, k2, k3, k4, kx = jax.random.split(key, 5)

    edge_embedding_size = 32
    batch, seq = 2, 8

    # Deterministic parameters (PyTorch-convention shapes).
    base_embed = jax.random.normal(k1, (NUM_BASE, EMBED), jnp.float32)
    dist_embed = jax.random.normal(k2, (NUM_DIST, EMBED), jnp.float32)
    w = 0.3 * jax.random.normal(k3, (edge_embedding_size, 2 * EMBED), jnp.float32)
    b = 0.1 * jax.random.normal(k4, (edge_embedding_size,), jnp.float32)

    # Integer edge-type codes in [0, 15).
    x = jax.random.randint(kx, (batch, seq), 0, NUM_TYPES, jnp.int32)

    out = edge_type_embedding(x, base_embed, dist_embed, w, b)
    out = jax.block_until_ready(out)

    ref = _reference(x, base_embed, dist_embed, w, b)
    assert out.shape == (batch, seq, edge_embedding_size)
    assert jnp.allclose(out, ref, atol=1e-5, rtol=1e-5), "mismatch vs reference"

    print("KERNEL_OK")
</pallas_src>

<mosaic_0001>
module attributes {stable_mosaic.version = 11 : i64} {
  func.func @edge_embed_kernel(%arg0: i32, %arg1: memref<1x128xi32, #tpu.memory_space<vmem>>, %arg2: memref<32x16xf32, #tpu.memory_space<vmem>>, %arg3: memref<32x128xf32, #tpu.memory_space<vmem>>) attributes {dimension_semantics = [#tpu.dimension_semantics<parallel>], iteration_bounds = array<i64: 1>, scalar_prefetch = 0 : i64, scratch_operands = 0 : i64, tpu.core_type = #tpu.core_type<tc>, window_params = [{transform_indices = @transform_0, window_bounds = array<i64: 1, 128>}, {pipeline_mode = #tpu.pipeline_mode<synchronous>, transform_indices = @transform_1, window_bounds = array<i64: 32, 16>}, {transform_indices = @transform_2, window_bounds = array<i64: 32, 128>}]} {
    %c0 = arith.constant 0 : index
    %c0_0 = arith.constant 0 : index
    %0 = vector.load %arg1[%c0, %c0_0] : memref<1x128xi32, #tpu.memory_space<vmem>>, vector<1x128xi32>
    %1 = tpu.iota {dimensions = array<i32: 0>} : vector<16x128xi32>
    %2 = vector.broadcast %0 : vector<1x128xi32> to vector<16x128xi32>
    %3 = arith.cmpi eq, %1, %2 : vector<16x128xi32>
    %4 = arith.extui %3 : vector<16x128xi1> to vector<16x128xi32>
    %5 = arith.sitofp %4 : vector<16x128xi32> to vector<16x128xf32>
    %c0_1 = arith.constant 0 : index
    %c0_2 = arith.constant 0 : index
    %6 = vector.load %arg2[%c0_1, %c0_2] : memref<32x16xf32, #tpu.memory_space<vmem>>, vector<32x16xf32>
    %cst = arith.constant dense<0.000000e+00> : vector<32x128xf32>
    %7 = tpu.matmul %6, %5, %cst {dimension_numbers = #tpu.dot_dimension_numbers<[1], [0], [0], [1], [0, 0, 1, 1], [], []>} : vector<32x16xf32>, vector<16x128xf32>, vector<32x128xf32> -> vector<32x128xf32>
    %c0_3 = arith.constant 0 : index
    %c0_4 = arith.constant 0 : index
    %8 = vector.load %arg3[%c0_3, %c0_4] : memref<32x128xf32, #tpu.memory_space<vmem>>, vector<32x128xf32>
    tpu.vector_store %arg3[%c0_3, %c0_4], %7 {strides = array<i32>} : memref<32x128xf32, #tpu.memory_space<vmem>>, vector<32x128xf32>,
    return
  }
  func.func @transform_0(%arg0: i32) -> (i32, i32) {
    %c0_i32 = arith.constant 0 : i32
    %c0_i32_0 = arith.constant 0 : i32
    return %arg0, %c0_i32 : i32, i32
  }
  func.func @transform_1(%arg0: i32) -> (i32, i32) {
    %c0_i32 = arith.constant 0 : i32
    %c0_i32_0 = arith.constant 0 : i32
    %c0_i32_1 = arith.constant 0 : i32
    return %c0_i32, %c0_i32_0 : i32, i32
  }
  func.func @transform_2(%arg0: i32) -> (i32, i32) {
    %c0_i32 = arith.constant 0 : i32
    %c0_i32_0 = arith.constant 0 : i32
    return %c0_i32, %arg0 : i32, i32
  }
}

</mosaic_0001>

<bundles_post_ra>
// kernel: tpu_custom_call.1
= control target key start
LH: loop header
LB: loop body
LE: loop exit
PB: predicated region body
PF: predicated region fallthrough
CT: control target
= control target key end

     0   :  { %v13_v0 = vlaneseq  ;;  %vm30_vm0 = vcmask 130048   ;;  %s257_s0 = inlined_call_operand.vmem [shape: s32[1,128], index: 0, kind: input, shape index: {}]   ;;  %s258_s1 = inlined_call_operand.vmem [shape: f32[32,16], index: 1, kind: input, shape index: {}]   ;;  %s259_s2 = inlined_call_operand.hbm [shape: f32[32,128], index: 2, kind: output, shape index: {}]  }
   0x1   :  { %v26_v1 = vld [vmem:[%s258_s1] sm:$0xff]  ;;  %v28_v3 = vld [vmem:[%s258_s1 + $0x10] sm:$0xff] }
   0x2   :  { %v148_v2 = vld [vmem:[%s257_s0] ss:$0 sm:$0xff]  ;;  %167 = vmatprep.mubr.msk.f32.mxu0 %vm30_vm0, %v26_v1  ;;  %v14_v4 = vshrl.u32 %v13_v0, 7  ;;  %170 = vmatprep.mubr.msk.f32.mxu1 %vm30_vm0, %v28_v3 }
   0x3   :  { %7 = vsyncpa [#allocation3], 0  ;;  %v207_v6 = vmov 1.0|1.0   ;;  %v27_v7 = vld [vmem:[%s258_s1 + $0x8] sm:$0xff]  ;;  %v29_v8 = vld [vmem:[%s258_s1 + $0x18] sm:$0xff] }
   0x4   :  { %v15_v5 = vadd.s32 8, %v14_v4  ;;  %vm20_vm1 = vcmp.eq.s32.totalorder %v14_v4, %v148_v2  ;;  %s208_s18 = smov [#allocation2]  }
   0x5   :  { %s137_s19 = sshll.u32 %s208_s18, 4  ;;  %s138_s19 = int_to_ptr.vmem [resolvable:$true] %s137_s19 }
   0x6   :  { %vm21_vm2 = vcmp.eq.s32.totalorder %v15_v5, %v148_v2  ;;  %s183_s20 = scalar_lea.vmem %s138_s19, 512  ;;  %p188_p1 = scmp.lt.s32.totalorder %s138_s19, %s138_s19 }
   0x7   :  { %vm173_vm3 = vmpackc.low %vm21_vm2, %vm20_vm1  ;;  %p184_p0 = scmp.ne.s32.totalorder %s138_s19, %s183_s20  ;;  %p189_p2 = scmp.lt.s32.totalorder %s183_s20, %s183_s20 }
   0x8   :  { %174 = vmatprep.subr.msk.bf16.mxu0 %vm173_vm3, %v207_v6  ;;  %177 = vmatprep.subr.msk.bf16.mxu1 %vm173_vm3, %v207_v6 }
   0x9   :  { %176 = vmatpush3.bf16.msk.msra.mxu0 %vm173_vm3, %v207_v6  ;;  %178 = vmatpush3.bf16.msk.msra.mxu1 %vm173_vm3, %v207_v6  ;;  %p190_p3 = por %p189_p2, %p188_p1 }
   0xb   :  { %p191_p4 = pnand %p190_p3, %p184_p0 }
   0xc   :  { %168 = vmatmul.mubr.msk.f32.vlgmr.msra.gmra.mrb[0].mxu0 %vm30_vm0, %v27_v7  ;;  %171 = vmatmul.mubr.msk.f32.vlgmr.msra.gmra.mrb[0].mxu1 %vm30_vm0, %v29_v8 }
  0xdf   :  { %v169_v9 = vpop.f32.mrb[0].mxu0  ;;  %v172_v10 = vpop.f32.mrb[0].mxu1 }
  0xe0   :  { %129 = vst [vmem:[#allocation2 + $0x8] sm:$0xff] %v169_v9  ;;  %131 = vst [vmem:[#allocation2 + $0x18] sm:$0xff] %v172_v10  ;;  %v109_v11 = vpop.f32.mrb[1].mxu0  ;;  %v119_v12 = vpop.f32.mrb[1].mxu1 }
  0xe1   :  { %128 = vst [vmem:[#allocation2] sm:$0xff] %v109_v11  ;;  %130 = vst [vmem:[#allocation2 + $0x10] sm:$0xff] %v119_v12 }
  0xe2   :  { %194 = shalt.err (!%p191_p4)
}
  0xe3   :  { %s195_s22 = scalar_lea.hbm %s259_s2, 512 }
  0xe4   :  { %p196_p5 = scmp.ne.s32.totalorder %s259_s2, %s195_s22  ;;  %p199_p6 = scmp.lt.u32.totalorder %s195_s22, %s259_s2 }
  0xe6   :  { %p201_p7 = pnand %p199_p6, %p196_p5 }
  0xe8   :  { %204 = shalt.err (!%p201_p7)
}
  0xe9   :  { %s209_s27 = smov 128   ;;  %s210_s28 = smov 8  }
  0xea   :  { %143 = dma.vmem_to_hbm [thread:$0]  %s138_s19, 512, %s259_s2, [#allocation3], %s209_s27, %s209_s27, %s210_s28  }
  0xeb   :  { %205 = dma.done.wait [#allocation3], 512  }
  0xec   :  { %206 = vsyncadd [#allocation3], 4294966784 }
  0xed   :  { %147 = vsyncpa [#allocation3], 1 }

</bundles_post_ra>
